<compile_context>
chip_gen: v7x
topology: tpu7x:2x2x1
jax: 0.10.0
libtpu: 0.0.40
codegen_flags: <defaults>
</compile_context>

<pallas_src>
import functools

import jax
import jax.numpy as jnp
from jax.experimental import pallas as pl
from jax.experimental.pallas import tpu as pltpu

_LANES = 128
_SUBLANES = 8


# ----------------------------------------------------------------------------
# Kernel
# ----------------------------------------------------------------------------
def _capsule_loss_kernel(x_ref, y_ref, out_ref, *, tile_rows, n_valid, needs_mask):
    """Accumulate one (tile_rows, 128) slab of the flattened margin loss.

    x_ref / y_ref : (tile_rows, 128) logits / labels (any float dtype).
    out_ref       : (8, 128) f32 partial sum, resident across the reduction
                    (last) grid axis; the final cross-lane reduce + divide by
                    the true batch size happen in XLA.
    """
    p = pl.program_id(0)          # optional core split (size 1 by default)
    j = pl.program_id(1)          # batch-tile reduction axis
    nb = pl.num_programs(1)

    @pl.when(j == 0)
    def _init():
        out_ref[...] = jnp.zeros_like(out_ref)

    x = x_ref[...].astype(jnp.float32)
    y = y_ref[...].astype(jnp.float32)
    left = jnp.maximum(0.9 - x, 0.0)
    right = jnp.maximum(x - 0.1, 0.0)
    contrib = y * (left * left) + 0.5 * (1.0 - y) * (right * right)

    if needs_mask:
        # Exact mask over (a) the <=1023-element zero pad and (b) any ragged /
        # duplicated trailing tile.  Cheap VPU work; kernel is HBM-bound.
        base = (p * nb + j) * (tile_rows * _LANES)
        row = jax.lax.broadcasted_iota(jnp.int32, contrib.shape, 0)
        lane = jax.lax.broadcasted_iota(jnp.int32, contrib.shape, 1)
        flat = base + row * _LANES + lane
        contrib = jnp.where(flat < n_valid, contrib, 0.0)

    # (tr,128) -> (tr//8, 8, 128) is vreg-aligned (free); the axis-0 sum is
    # pure VALU vreg adds, keeping the resident accumulator a single vreg.
    out_ref[...] += contrib.reshape(-1, _SUBLANES, _LANES).sum(axis=0)


# ----------------------------------------------------------------------------
# Wrapper
# ----------------------------------------------------------------------------
def _round_up(x, m):
    return (x + m - 1) // m * m


def _pick_tile_rows(rows, cap):
    """rows is a multiple of 8.  Prefer a tile height that divides rows exactly
    (no ragged edge block); otherwise use the cap and mask the ragged edge."""
    if rows <= cap:
        return rows
    for cand in range(cap, 255, -_SUBLANES):      # keep tiles >= 256 rows
        if rows % cand == 0:
            return cand
    return cap                                     # ragged edge handled by mask


def capsule_loss(logits: jax.Array, labels: jax.Array, *, tile_rows=2048, num_cores=1):
    """Margin (capsule) loss matching the PyTorch module exactly."""
    assert logits.shape == labels.shape and logits.ndim >= 1
    batch = logits.shape[0]
    n = logits.size

    # Lane-dense repack: flatten (free reshape) and view as (rows, 128).
    # Only the tiny sub-1024 tail is ever padded.
    x = logits.reshape(-1)
    y = labels.reshape(-1)
    n_pad = _round_up(n, _SUBLANES * _LANES)
    if n_pad != n:
        x = jnp.pad(x, (0, n_pad - n))
        y = jnp.pad(y, (0, n_pad - n))
    rows = n_pad // _LANES                         # multiple of 8
    x = x.reshape(rows, _LANES)
    y = y.reshape(rows, _LANES)

    cap = max(_SUBLANES, tile_rows - tile_rows % _SUBLANES)
    tr = _pick_tile_rows(rows, cap)
    nb = pl.cdiv(rows, num_cores * tr)
    covered = num_cores * nb * tr * _LANES
    needs_mask = covered != n
    last_block = pl.cdiv(rows, tr) - 1

    def in_index(p, j, _nb=nb, _last=last_block):
        # Clamp so a trailing tile (covered > rows) never starts past the array
        # edge; its contribution is fully masked to zero in the kernel.
        return (jnp.minimum(p * _nb + j, _last), 0)

    kernel = functools.partial(
        _capsule_loss_kernel, tile_rows=tr, n_valid=n, needs_mask=needs_mask)

    partials = pl.pallas_call(
        kernel,
        out_shape=jax.ShapeDtypeStruct((num_cores * _SUBLANES, _LANES), jnp.float32),
        grid=(num_cores, nb),
        in_specs=[
            pl.BlockSpec((tr, _LANES), in_index),
            pl.BlockSpec((tr, _LANES), in_index),
        ],
        # (8,128) accumulator block stays resident across the "arbitrary" axis.
        out_specs=pl.BlockSpec((_SUBLANES, _LANES), lambda p, j: (p, 0)),
        compiler_params=pltpu.CompilerParams(
            dimension_semantics=("parallel", "arbitrary"),
            vmem_limit_bytes=32 * 1024 * 1024,
        ),
        cost_estimate=pl.CostEstimate(
            flops=10 * n,
            transcendentals=0,
            bytes_accessed=int(
                n * (logits.dtype.itemsize + labels.dtype.itemsize)
                + num_cores * _SUBLANES * _LANES * 4),
        ),
    )(x, y)

    # Tiny XLA combine (1024 * num_cores floats); divide by the TRUE batch size.
    return jnp.sum(partials) / jnp.float32(batch)


# ----------------------------------------------------------------------------
# Pure-JAX reference
# ----------------------------------------------------------------------------
def capsule_loss_ref(logits, labels):
    logits = logits.astype(jnp.float32)
    labels = labels.astype(jnp.float32)
    left = jnp.maximum(0.9 - logits, 0.0) ** 2
    right = jnp.maximum(logits - 0.1, 0.0) ** 2
    return jnp.sum(labels * left + 0.5 * (1.0 - labels) * right) / logits.shape[0]


if __name__ == "__main__":
    key = jax.random.PRNGKey(0)
    k1, k2, k3, k4, k5, k6 = jax.random.split(key, 6)

    # Small shape consistent with the module: batch=8, 10 capsule classes.
    B, C = 8, 10
    logits = jax.random.uniform(k1, (B, C), dtype=jnp.float32)
    labels = jax.nn.one_hot(jax.random.randint(k2, (B,), 0, C), C, dtype=jnp.float32)
    ref = capsule_loss_ref(logits, labels)
    out = capsule_loss(logits, labels)
    jax.block_until_ready(out)
    assert jnp.allclose(out, ref, rtol=1e-5, atol=1e-5), (out, ref)

    # bf16 logits (mem-bound op: halves logit traffic; accumulation stays f32).
    out_bf16 = capsule_loss(logits.astype(jnp.bfloat16), labels)
    ref_bf16 = capsule_loss_ref(logits.astype(jnp.bfloat16).astype(jnp.float32), labels)
    jax.block_until_ready(out_bf16)
    assert jnp.allclose(out_bf16, ref_bf16, rtol=1e-5, atol=1e-5), (out_bf16, ref_bf16)

    # Multi-step streaming path (small tiles forced): several (8,128) tiles plus
    # the in-kernel tail mask (2560 real elements, padded flat length 3072).
    B2, C2 = 256, 10
    logits2 = jax.random.uniform(k3, (B2, C2), dtype=jnp.float32)
    labels2 = jax.nn.one_hot(jax.random.randint(k4, (B2,), 0, C2), C2, dtype=jnp.float32)
    ref2 = capsule_loss_ref(logits2, labels2)
    out2 = capsule_loss(logits2, labels2, tile_rows=8)
    jax.block_until_ready(out2)
    assert jnp.allclose(out2, ref2, rtol=1e-5, atol=1e-5), (out2, ref2)

    # Optional 2-core split (v7x style): leading "parallel" axis of 2.
    B3, C3 = 400, 10
    logits3 = jax.random.uniform(k5, (B3, C3), dtype=jnp.float32)
    labels3 = jax.nn.one_hot(jax.random.randint(k6, (B3,), 0, C3), C3, dtype=jnp.float32)
    ref3 = capsule_loss_ref(logits3, labels3)
    out3 = capsule_loss(logits3, labels3, tile_rows=8, num_cores=2)
    jax.block_until_ready(out3)
    assert jnp.allclose(out3, ref3, rtol=1e-5, atol=1e-5), (out3, ref3)

    # Default-config streaming path: two 2048x128 tiles, masked 1024-pad tail.
    B4, C4 = 52428, 10
    logits4 = jax.random.uniform(k1, (B4, C4), dtype=jnp.float32)
    labels4 = jax.nn.one_hot(jax.random.randint(k2, (B4,), 0, C4), C4, dtype=jnp.float32)
    ref4 = capsule_loss_ref(logits4, labels4)
    out4 = capsule_loss(logits4, labels4)
    jax.block_until_ready(out4)
    assert jnp.allclose(out4, ref4, rtol=1e-3, atol=1e-3), (out4, ref4)

    print("KERNEL_OK")
</pallas_src>

<mosaic_0001>
module attributes {stable_mosaic.version = 11 : i64} {
  func.func @_capsule_loss_kernel(%arg0: i32, %arg1: i32, %arg2: memref<8x128xf32, #tpu.memory_space<vmem>>, %arg3: memref<8x128xf32, #tpu.memory_space<vmem>>, %arg4: memref<8x128xf32, #tpu.memory_space<vmem>>) attributes {dimension_semantics = [#tpu.dimension_semantics<parallel>, #tpu.dimension_semantics<arbitrary>], iteration_bounds = array<i64: 1, 1>, scalar_prefetch = 0 : i64, scratch_operands = 0 : i64, tpu.core_type = #tpu.core_type<tc>, window_params = [{transform_indices = @transform_0, window_bounds = array<i64: 8, 128>}, {transform_indices = @transform_1, window_bounds = array<i64: 8, 128>}, {transform_indices = @transform_2, window_bounds = array<i64: 8, 128>}]} {
    %c0_i32 = arith.constant 0 : i32
    %0 = arith.cmpi eq, %arg1, %c0_i32 : i32
    %1 = arith.extui %0 : i1 to i32
    %c0_i32_0 = arith.constant 0 : i32
    %2 = arith.cmpi ne, %1, %c0_i32_0 : i32
    scf.if %2 {
      %cst_15 = arith.constant 0.000000e+00 : f32
      %41 = vector.broadcast %cst_15 : f32 to vector<8x128xf32>
      %c0_16 = arith.constant 0 : index
      %c0_17 = arith.constant 0 : index
      %42 = vector.load %arg4[%c0_16, %c0_17] : memref<8x128xf32, #tpu.memory_space<vmem>>, vector<8x128xf32>
      tpu.vector_store %arg4[%c0_16, %c0_17], %41 {strides = array<i32>} : memref<8x128xf32, #tpu.memory_space<vmem>>, vector<8x128xf32>,
    } else {
    }
    %c0 = arith.constant 0 : index
    %c0_1 = arith.constant 0 : index
    %3 = vector.load %arg2[%c0, %c0_1] : memref<8x128xf32, #tpu.memory_space<vmem>>, vector<8x128xf32>
    %c0_2 = arith.constant 0 : index
    %c0_3 = arith.constant 0 : index
    %4 = vector.load %arg3[%c0_2, %c0_3] : memref<8x128xf32, #tpu.memory_space<vmem>>, vector<8x128xf32>
    %cst = arith.constant 0.899999976 : f32
    %5 = vector.broadcast %cst : f32 to vector<8x128xf32>
    %6 = arith.subf %5, %3 : vector<8x128xf32>
    %cst_4 = arith.constant 0.000000e+00 : f32
    %7 = vector.broadcast %cst_4 : f32 to vector<8x128xf32>
    %8 = arith.maximumf %6, %7 : vector<8x128xf32>
    %cst_5 = arith.constant 1.000000e-01 : f32
    %9 = vector.broadcast %cst_5 : f32 to vector<8x128xf32>
    %10 = arith.subf %3, %9 : vector<8x128xf32>
    %cst_6 = arith.constant 0.000000e+00 : f32
    %11 = vector.broadcast %cst_6 : f32 to vector<8x128xf32>
    %12 = arith.maximumf %10, %11 : vector<8x128xf32>
    %13 = arith.mulf %8, %8 : vector<8x128xf32>
    %14 = arith.mulf %4, %13 : vector<8x128xf32>
    %cst_7 = arith.constant 1.000000e+00 : f32
    %15 = vector.broadcast %cst_7 : f32 to vector<8x128xf32>
    %16 = arith.subf %15, %4 : vector<8x128xf32>
    %cst_8 = arith.constant 5.000000e-01 : f32
    %17 = vector.broadcast %cst_8 : f32 to vector<8x128xf32>
    %18 = arith.mulf %17, %16 : vector<8x128xf32>
    %19 = arith.mulf %12, %12 : vector<8x128xf32>
    %20 = arith.mulf %18, %19 : vector<8x128xf32>
    %21 = arith.addf %14, %20 : vector<8x128xf32>
    %c1_i32 = arith.constant 1 : i32
    %22 = arith.muli %arg0, %c1_i32 : i32
    %23 = arith.addi %22, %arg1 : i32
    %c1024_i32 = arith.constant 1024 : i32
    %24 = arith.muli %23, %c1024_i32 : i32
    %25 = tpu.iota {dimensions = array<i32: 0>} : vector<8x128xi32>
    %26 = tpu.iota {dimensions = array<i32: 1>} : vector<8x128xi32>
    %c128_i32 = arith.constant 128 : i32
    %27 = vector.broadcast %c128_i32 : i32 to vector<8x128xi32>
    %28 = arith.muli %25, %27 : vector<8x128xi32>
    %29 = vector.broadcast %24 : i32 to vector<8x128xi32>
    %30 = arith.addi %29, %28 : vector<8x128xi32>
    %31 = arith.addi %30, %26 : vector<8x128xi32>
    %c80_i32 = arith.constant 80 : i32
    %32 = vector.broadcast %c80_i32 : i32 to vector<8x128xi32>
    %33 = arith.cmpi slt, %31, %32 : vector<8x128xi32>
    %cst_9 = arith.constant 0.000000e+00 : f32
    %34 = vector.broadcast %cst_9 : f32 to vector<8x128xf32>
    %35 = arith.select %33, %21, %34 : vector<8x128xi1>, vector<8x128xf32>
    %c0_10 = arith.constant 0 : index
    %c0_11 = arith.constant 0 : index
    %36 = vector.load %arg4[%c0_10, %c0_11] : memref<8x128xf32, #tpu.memory_space<vmem>>, vector<8x128xf32>
    %37 = vector.shape_cast %35 : vector<8x128xf32> to vector<1x8x128xf32>
    %cst_12 = arith.constant dense<0.000000e+00> : vector<8x128xf32>
    %38 = vector.multi_reduction <add>, %37, %cst_12 [0] : vector<1x8x128xf32> to vector<8x128xf32>
    %39 = arith.addf %36, %38 : vector<8x128xf32>
    %c0_13 = arith.constant 0 : index
    %c0_14 = arith.constant 0 : index
    %40 = vector.load %arg4[%c0_13, %c0_14] : memref<8x128xf32, #tpu.memory_space<vmem>>, vector<8x128xf32>
    tpu.vector_store %arg4[%c0_13, %c0_14], %39 {strides = array<i32>} : memref<8x128xf32, #tpu.memory_space<vmem>>, vector<8x128xf32>,
    return
  }
  func.func @transform_0(%arg0: i32, %arg1: i32) -> (i32, i32) {
    %c1_i32 = arith.constant 1 : i32
    %0 = arith.muli %arg0, %c1_i32 : i32
    %1 = arith.addi %0, %arg1 : i32
    %c0_i32 = arith.constant 0 : i32
    %2 = arith.minsi %1, %c0_i32 : i32
    %c0_i32_0 = arith.constant 0 : i32
    %c0_i32_1 = arith.constant 0 : i32
    return %2, %c0_i32_0 : i32, i32
  }
  func.func @transform_1(%arg0: i32, %arg1: i32) -> (i32, i32) {
    %c1_i32 = arith.constant 1 : i32
    %0 = arith.muli %arg0, %c1_i32 : i32
    %1 = arith.addi %0, %arg1 : i32
    %c0_i32 = arith.constant 0 : i32
    %2 = arith.minsi %1, %c0_i32 : i32
    %c0_i32_0 = arith.constant 0 : i32
    %c0_i32_1 = arith.constant 0 : i32
    return %2, %c0_i32_0 : i32, i32
  }
  func.func @transform_2(%arg0: i32, %arg1: i32) -> (i32, i32) {
    %c0_i32 = arith.constant 0 : i32
    %c0_i32_0 = arith.constant 0 : i32
    return %arg0, %c0_i32 : i32, i32
  }
}

</mosaic_0001>

<bundles_post_ra>
// kernel: tpu_custom_call.1
= control target key start
LH: loop header
LB: loop body
LE: loop exit
PB: predicated region body
PF: predicated region fallthrough
CT: control target
= control target key end

     0   :  { %7 = vsyncpa [#allocation3], 0  ;;  %s237_s0 = inlined_call_operand.hbm [shape: f32[8,128], index: 0, kind: input, shape index: {}]   ;;  %s238_s1 = inlined_call_operand.hbm [shape: f32[8,128], index: 1, kind: input, shape index: {}]   ;;  %s239_s2 = inlined_call_operand.hbm [shape: f32[8,128], index: 2, kind: output, shape index: {}]  }
   0x1   :  { %8 = vsyncpa [#allocation6], 0 }
   0x2   :  { %9 = vsyncpa [#allocation4], 0  ;;  %s183_s9 = smov [#allocation2]   ;;  %s184_s11 = smov [#allocation5]  }
   0x3   :  { %s21_s10 = sshll.u32 %s183_s9, 4  ;;  %s36_s12 = sshll.u32 %s184_s11, 4  ;;  %s22_s10 = int_to_ptr.vmem [resolvable:$true] %s21_s10  ;;  %s37_s12 = int_to_ptr.vmem [resolvable:$true] %s36_s12 }
   0x4   :  { %s111_s15 = scalar_lea.hbm %s237_s0, 128 }
   0x5   :  { %p112_p0 = scmp.ne.s32.totalorder %s237_s0, %s111_s15  ;;  %p115_p1 = scmp.lt.u32.totalorder %s111_s15, %s237_s0 }
   0x7   :  { %p117_p2 = pnand %p115_p1, %p112_p0 }
   0x9   :  { %120 = shalt.err (!%p117_p2)
}
   0xa   :  { %s121_s20 = scalar_lea.vmem %s22_s10, 128  ;;  %p126_p4 = scmp.lt.s32.totalorder %s22_s10, %s22_s10 }
   0xb   :  { %p122_p3 = scmp.ne.s32.totalorder %s22_s10, %s121_s20  ;;  %p127_p5 = scmp.lt.s32.totalorder %s121_s20, %s121_s20 }
   0xd   :  { %p128_p6 = por %p127_p5, %p126_p4 }
   0xf   :  { %p129_p7 = pnand %p128_p6, %p122_p3 }
  0x11   :  { %132 = shalt.err (!%p129_p7)
}
  0x12   :  { %24 = dma.hbm_to_vmem [thread:$0]  %s237_s0, 128, %s22_s10, [#allocation3]  }
  0x13   :  { %s133_s25 = scalar_lea.hbm %s238_s1, 128 }
  0x14   :  { %p134_p8 = scmp.ne.s32.totalorder %s238_s1, %s133_s25  ;;  %p137_p9 = scmp.lt.u32.totalorder %s133_s25, %s238_s1 }
  0x16   :  { %p139_p10 = pnand %p137_p9, %p134_p8 }
  0x18   :  { %142 = shalt.err (!%p139_p10)
}
  0x19   :  { %s143_s30 = scalar_lea.vmem %s37_s12, 128  ;;  %p148_p12 = scmp.lt.s32.totalorder %s37_s12, %s37_s12 }
  0x1a   :  { %p144_p11 = scmp.ne.s32.totalorder %s37_s12, %s143_s30  ;;  %p149_p13 = scmp.lt.s32.totalorder %s143_s30, %s143_s30 }
  0x1c   :  { %p150_p0 = por %p149_p13, %p148_p12 }
  0x1e   :  { %p151_p1 = pnand %p150_p0, %p144_p11 }
  0x20   :  { %154 = shalt.err (!%p151_p1)
}
  0x21   :  { %39 = dma.hbm_to_vmem [thread:$0]  %s238_s1, 128, %s37_s12, [#allocation6]  }
  0x22   :  { %177 = dma.done.wait [#allocation3], 128  }
  0x23   :  { %178 = vsyncadd [#allocation3], 4294967168 }
  0x24   :  { %179 = dma.done.wait [#allocation6], 128  }
  0x25   :  { %180 = vsyncadd [#allocation6], 4294967168  ;;  %v72_v0 = vlaneseq  ;;  %v57_v2 = vld [vmem:[#allocation2] sm:$0xff]  ;;  %v58_v3 = vld [vmem:[#allocation5] sm:$0xff]  ;;  %s185_s1 = smov [#allocation7]  }
  0x26   :  { %v59_v6 = vsub.f32 0.9, %v57_v2  ;;  %v106_v7 = vadd.f32 -0.1, %v57_v2  ;;  %v65_v8 = vsub.f32 1.0, %v58_v3  ;;  %s92_s4 = sshll.u32 %s185_s1, 4  ;;  %s93_s4 = int_to_ptr.vmem [resolvable:$true] %s92_s4 }
  0x27   :  { %v73_v1 = vshrl.u32 %v72_v0, 7  ;;  %v75_v4 = vand.u32 127, %v72_v0  ;;  %s155_s5 = scalar_lea.vmem %s93_s4, 128  ;;  %p160_p3 = scmp.lt.s32.totalorder %s93_s4, %s93_s4 }
  0x28   :  { %v60_v9 = vmax.f32 %v59_v6, 0.0  ;;  %v62_v10 = vmax.f32 %v106_v7, 0.0  ;;  %v66_v11 = vmul.f32 0.5, %v65_v8  ;;  %p156_p2 = scmp.ne.s32.totalorder %s93_s4, %s155_s5  ;;  %p161_p4 = scmp.lt.s32.totalorder %s155_s5, %s155_s5 }
  0x29   :  { %v76_v5 = vmul.u32 128, %v73_v1 }
  0x2a   :  { %v63_v13 = vmul.f32 %v60_v9, %v60_v9  ;;  %v67_v14 = vmul.f32 %v62_v10, %v62_v10  ;;  %p162_p5 = por %p161_p4, %p160_p3 }
  0x2b   :  { %v79_v12 = vadd.s32 %v76_v5, %v75_v4 }
  0x2c   :  { %v64_v15 = vmul.f32 %v63_v13, %v58_v3  ;;  %v68_v16 = vmul.f32 %v67_v14, %v66_v11  ;;  %p163_p6 = pnand %p162_p5, %p156_p2 }
  0x2d   :  { %vm80_vm0 = vcmp.lt.s32.totalorder %v79_v12, 80 }
  0x2e   :  { %v69_v17 = vadd.f32 %v68_v16, %v64_v15 }
  0x30   :  { %v81_v18 = vsel %vm80_vm0, %v69_v17, 0.0 }
  0x31   :  { %85 = vst [vmem:[#allocation7] sm:$0xff] %v81_v18 }
  0x32   :  { %166 = shalt.err (!%p163_p6)
}
  0x33   :  { %s167_s8 = scalar_lea.hbm %s239_s2, 128 }
  0x34   :  { %p168_p7 = scmp.ne.s32.totalorder %s239_s2, %s167_s8  ;;  %p171_p8 = scmp.lt.u32.totalorder %s167_s8, %s239_s2 }
  0x36   :  { %p173_p9 = pnand %p171_p8, %p168_p7 }
  0x38   :  { %176 = shalt.err (!%p173_p9)
}
  0x39   :  { %95 = dma.vmem_to_hbm [thread:$0]  %s93_s4, 128, %s239_s2, [#allocation4]  }
  0x3a   :  { %181 = dma.done.wait [#allocation4], 128  }
  0x3b   :  { %182 = vsyncadd [#allocation4], 4294967168 }
  0x3c   :  { %99 = vsyncpa [#allocation3], 1 }
  0x3d   :  { %100 = vsyncpa [#allocation6], 1 }
  0x3e   :  { %101 = vsyncpa [#allocation4], 1 }

</bundles_post_ra>
